<compile_context>
chip_gen: v5e
topology: v5e:2x2
jax: 0.10.0
libtpu: 0.0.40
codegen_flags: <defaults>
</compile_context>

<pallas_src>
import functools

import jax
import jax.numpy as jnp
from jax.experimental import pallas as pl
from jax.experimental.pallas import tpu as pltpu

EPS = 1e-5


def _fact_reduce_kernel(x_ref, w_ref, g_ref, b_ref, o_ref, sum_ref, sq_ref, *,
                        inv_m):
    """One (branch, phase, batch, spatial-tile) grid step.

    x_ref : (C_in, tS)  stride-2 gathered activations for this branch
    w_ref : (Ch, C_in)  1x1 conv weight for this branch
    g_ref : (Ch, 1)     BN gamma (this branch's channel half)
    b_ref : (Ch, 1)     BN beta
    o_ref : (Ch, tS)    output tile (this branch's channel half)
    sum_ref, sq_ref : (Ch, 1) f32 scratch -- running per-channel sum / sum-sq
    """
    p = pl.program_id(1)   # phase: 0 = accumulate stats, 1 = normalise + store
    n = pl.program_id(2)   # batch element
    s = pl.program_id(3)   # spatial tile

    # ReLU (VPU) + 1x1 stride-2 conv as (Ch, C_in) @ (C_in, tS) matmul (MXU).
    x = jnp.maximum(x_ref[...], 0.0)
    y = jnp.dot(w_ref[...], x, preferred_element_type=jnp.float32)

    @pl.when((p == 0) & (n == 0) & (s == 0))
    def _init():
        sum_ref[...] = jnp.zeros_like(sum_ref)
        sq_ref[...] = jnp.zeros_like(sq_ref)

    @pl.when(p == 0)
    def _accumulate():
        sum_ref[...] += jnp.sum(y, axis=1, keepdims=True)
        sq_ref[...] += jnp.sum(y * y, axis=1, keepdims=True)

    @pl.when(p == 1)
    def _normalize():
        mean = sum_ref[...] * inv_m
        # Biased (train-mode) variance; clamp against f32 cancellation.
        var = jnp.maximum(sq_ref[...] * inv_m - mean * mean, 0.0)
        a = g_ref[...] * jax.lax.rsqrt(var + EPS)   # fused scale
        b = b_ref[...] - mean * a                   # fused shift
        o_ref[...] = y * a + b


def _spatial_tile(S):
    """Pick a lane-dense spatial tile and the (possibly padded) spatial extent."""
    for t in (512, 256, 128):
        if S % t == 0:
            return t, S
    if S <= 128:
        return S, S                      # single full-extent block
    Sp = pl.cdiv(S, 128) * 128           # zero-pad tail; zeros do not perturb BN stats
    return 128, Sp


@jax.jit
def factorized_reduce(x_nchw, w1_pt, w2_pt, gamma, beta):
    """x_nchw: (N, C_in, H, W); w*_pt: (C_out//2, C_in, 1, 1); gamma/beta: (C_out,)."""
    N, C_in, H, W = x_nchw.shape
    assert H % 2 == 0 and W % 2 == 0, "FactorizedReduce requires even H and W"
    Ch = w1_pt.shape[0]                  # C_out // 2
    assert w2_pt.shape[0] == Ch and gamma.shape[0] == 2 * Ch
    Ho, Wo = H // 2, W // 2
    S = Ho * Wo
    M = N * S                            # rows reduced over by BatchNorm

    tS, Sp = _spatial_tile(S)
    n_s = Sp // tS

    # Single fused gather: both stride-2 taps, channels-major, no transpose.
    x6 = x_nchw.reshape(N, C_in, Ho, 2, Wo, 2)
    xe = x6[:, :, :, 0, :, 0]            # branch 1 taps (even rows/cols)
    xo = x6[:, :, :, 1, :, 1]            # branch 2 taps == x[:, :, 1:, 1:] stride 2
    xb = jnp.stack([xe, xo], axis=0).reshape(2, N, C_in, S)
    if Sp != S:
        xb = jnp.pad(xb, ((0, 0), (0, 0), (0, 0), (0, Sp - S)))

    # 1x1 conv weights -> (branch, Ch, C_in) matmul LHS; per-branch BN affine.
    wb = jnp.stack([w1_pt.reshape(Ch, C_in), w2_pt.reshape(Ch, C_in)], axis=0)
    gb = gamma.reshape(2, Ch, 1).astype(jnp.float32)
    bb = beta.reshape(2, Ch, 1).astype(jnp.float32)

    grid = (2, 2, N, n_s)                # (branch, phase, batch, spatial tile)

    x_spec = pl.BlockSpec((None, None, C_in, tS), lambda br, p, n, s: (br, n, 0, s))
    w_spec = pl.BlockSpec((None, Ch, C_in), lambda br, p, n, s: (br, 0, 0))
    v_spec = pl.BlockSpec((None, Ch, 1), lambda br, p, n, s: (br, 0, 0))
    # Phase 0 pins the output block (no writeback); phase 1 streams real tiles.
    o_spec = pl.BlockSpec((None, None, Ch, tS),
                          lambda br, p, n, s: (n * p, br, 0, s * p))

    out = pl.pallas_call(
        functools.partial(_fact_reduce_kernel, inv_m=1.0 / float(M)),
        out_shape=jax.ShapeDtypeStruct((N, 2, Ch, Sp), jnp.float32),
        grid_spec=pltpu.PrefetchScalarGridSpec(
            num_scalar_prefetch=0,
            grid=grid,
            in_specs=[x_spec, w_spec, v_spec, v_spec],
            out_specs=o_spec,
            scratch_shapes=[pltpu.VMEM((Ch, 1), jnp.float32),
                            pltpu.VMEM((Ch, 1), jnp.float32)]),
        compiler_params=pltpu.CompilerParams(
            # Branches are independent (disjoint BN channel halves) -> parallel
            # across v7x's two TensorCores.  phase/batch/spatial carry the global
            # BN reduction through the scratch accumulators -> arbitrary.
            dimension_semantics=("parallel", "arbitrary", "arbitrary", "arbitrary"),
            vmem_limit_bytes=32 * 1024 * 1024),
    )(xb, wb, gb, bb)

    if Sp != S:
        out = out[:, :, :, :S]
    # (N, 2, Ch, Ho*Wo) -> (N, C_out, Ho, Wo): pure reshape, no transpose/copy.
    return out.reshape(N, 2 * Ch, Ho, Wo)


def factorized_reduce_ref(x, w1_pt, w2_pt, gamma, beta):
    """Pure-JAX reference mirroring the PyTorch forward (train-mode BN)."""
    C_out_half, C_in, _, _ = w1_pt.shape
    xr = jnp.maximum(x, 0.0)
    w1 = w1_pt.reshape(C_out_half, C_in)
    w2 = w2_pt.reshape(C_out_half, C_in)
    y1 = jnp.einsum('nchw,oc->nohw', xr[:, :, 0::2, 0::2], w1)
    y2 = jnp.einsum('nchw,oc->nohw', xr[:, :, 1::2, 1::2], w2)
    y = jnp.concatenate([y1, y2], axis=1)
    mean = y.mean(axis=(0, 2, 3), keepdims=True)
    var = ((y - mean) ** 2).mean(axis=(0, 2, 3), keepdims=True)
    yhat = (y - mean) / jnp.sqrt(var + EPS)
    return yhat * gamma[None, :, None, None] + beta[None, :, None, None]


if __name__ == "__main__":
    N, C_in, H, W = 2, 4, 16, 16
    C_out = 8

    key = jax.random.PRNGKey(0)
    kx, kw1, kw2 = jax.random.split(key, 3)

    x = jax.random.normal(kx, (N, C_in, H, W), dtype=jnp.float32)
    # PyTorch conv weights (C_out//2, C_in, 1, 1), bias=False.
    w1_pt = 0.1 * jax.random.normal(kw1, (C_out // 2, C_in, 1, 1), dtype=jnp.float32)
    w2_pt = 0.1 * jax.random.normal(kw2, (C_out // 2, C_in, 1, 1), dtype=jnp.float32)
    # BatchNorm2d(affine=True) default init: weight=1, bias=0.
    gamma = jnp.ones((C_out,), dtype=jnp.float32)
    beta = jnp.zeros((C_out,), dtype=jnp.float32)

    out = factorized_reduce(x, w1_pt, w2_pt, gamma, beta)
    out = jax.block_until_ready(out)

    ref = factorized_reduce_ref(x, w1_pt, w2_pt, gamma, beta)
    assert out.shape == (N, C_out, H // 2, W // 2), out.shape
    max_err = float(jnp.max(jnp.abs(out - ref)))
    assert jnp.allclose(out, ref, atol=1e-3, rtol=1e-3), f"mismatch vs reference (max abs err {max_err})"

    print("KERNEL_OK")
</pallas_src>

<mosaic_0001>
module attributes {stable_mosaic.version = 11 : i64} {
  func.func @_fact_reduce_kernel(%arg0: i32, %arg1: i32, %arg2: i32, %arg3: i32, %arg4: memref<1x1x4x64xf32, #tpu.memory_space<vmem>>, %arg5: memref<1x4x4xf32, #tpu.memory_space<vmem>>, %arg6: memref<1x4x1xf32, #tpu.memory_space<vmem>>, %arg7: memref<1x4x1xf32, #tpu.memory_space<vmem>>, %arg8: memref<1x1x4x64xf32, #tpu.memory_space<vmem>>, %arg9: memref<4x1xf32, #tpu.memory_space<vmem>>, %arg10: memref<4x1xf32, #tpu.memory_space<vmem>>) attributes {dimension_semantics = [#tpu.dimension_semantics<parallel>, #tpu.dimension_semantics<arbitrary>, #tpu.dimension_semantics<arbitrary>, #tpu.dimension_semantics<arbitrary>], iteration_bounds = array<i64: 2, 2, 2, 1>, scalar_prefetch = 0 : i64, scratch_operands = 2 : i64, tpu.core_type = #tpu.core_type<tc>, window_params = [{transform_indices = @transform_0, window_bounds = array<i64: 1, 1, 4, 64>}, {transform_indices = @transform_1, window_bounds = array<i64: 1, 4, 4>}, {transform_indices = @transform_2, window_bounds = array<i64: 1, 4, 1>}, {transform_indices = @transform_3, window_bounds = array<i64: 1, 4, 1>}, {transform_indices = @transform_4, window_bounds = array<i64: 1, 1, 4, 64>}]} {
    %c0 = arith.constant 0 : index
    %c0_0 = arith.constant 0 : index
    %c0_1 = arith.constant 0 : index
    %c0_2 = arith.constant 0 : index
    %0 = vector.load %arg4[%c0, %c0_0, %c0_1, %c0_2] : memref<1x1x4x64xf32, #tpu.memory_space<vmem>>, vector<1x1x4x64xf32>
    %1 = vector.shape_cast %0 : vector<1x1x4x64xf32> to vector<4x64xf32>
    %cst = arith.constant 0.000000e+00 : f32
    %2 = vector.broadcast %cst : f32 to vector<4x64xf32>
    %3 = arith.maximumf %1, %2 : vector<4x64xf32>
    %c0_3 = arith.constant 0 : index
    %c0_4 = arith.constant 0 : index
    %c0_5 = arith.constant 0 : index
    %4 = vector.load %arg5[%c0_3, %c0_4, %c0_5] : memref<1x4x4xf32, #tpu.memory_space<vmem>>, vector<1x4x4xf32>
    %5 = vector.shape_cast %4 : vector<1x4x4xf32> to vector<4x4xf32>
    %cst_6 = arith.constant dense<0.000000e+00> : vector<4x64xf32>
    %6 = tpu.matmul %5, %3, %cst_6 {dimension_numbers = #tpu.dot_dimension_numbers<[1], [0], [0], [1], [0, 0, 1, 1], [], []>} : vector<4x4xf32>, vector<4x64xf32>, vector<4x64xf32> -> vector<4x64xf32>
    %c0_i32 = arith.constant 0 : i32
    %7 = arith.cmpi eq, %arg1, %c0_i32 : i32
    %c0_i32_7 = arith.constant 0 : i32
    %8 = arith.cmpi eq, %arg2, %c0_i32_7 : i32
    %9 = arith.andi %7, %8 : i1
    %c0_i32_8 = arith.constant 0 : i32
    %10 = arith.cmpi eq, %arg3, %c0_i32_8 : i32
    %11 = arith.andi %9, %10 : i1
    %12 = arith.extui %11 : i1 to i32
    %c0_i32_9 = arith.constant 0 : i32
    %13 = arith.cmpi ne, %12, %c0_i32_9 : i32
    scf.if %13 {
      %cst_13 = arith.constant 0.000000e+00 : f32
      %20 = vector.broadcast %cst_13 : f32 to vector<4x1xf32>
      %c0_14 = arith.constant 0 : index
      %c0_15 = arith.constant 0 : index
      %21 = vector.load %arg9[%c0_14, %c0_15] : memref<4x1xf32, #tpu.memory_space<vmem>>, vector<4x1xf32>
      tpu.vector_store %arg9[%c0_14, %c0_15], %20 {strides = array<i32>} : memref<4x1xf32, #tpu.memory_space<vmem>>, vector<4x1xf32>,
      %cst_16 = arith.constant 0.000000e+00 : f32
      %22 = vector.broadcast %cst_16 : f32 to vector<4x1xf32>
      %c0_17 = arith.constant 0 : index
      %c0_18 = arith.constant 0 : index
      %23 = vector.load %arg10[%c0_17, %c0_18] : memref<4x1xf32, #tpu.memory_space<vmem>>, vector<4x1xf32>
      tpu.vector_store %arg10[%c0_17, %c0_18], %22 {strides = array<i32>} : memref<4x1xf32, #tpu.memory_space<vmem>>, vector<4x1xf32>,
    } else {
    }
    %c0_i32_10 = arith.constant 0 : i32
    %14 = arith.cmpi eq, %arg1, %c0_i32_10 : i32
    %15 = arith.extui %14 : i1 to i32
    %c0_i32_11 = arith.constant 0 : i32
    %16 = arith.cmpi ne, %15, %c0_i32_11 : i32
    scf.if %16 {
      %c0_13 = arith.constant 0 : index
      %c0_14 = arith.constant 0 : index
      %20 = vector.load %arg9[%c0_13, %c0_14] : memref<4x1xf32, #tpu.memory_space<vmem>>, vector<4x1xf32>
      %cst_15 = arith.constant dense<0.000000e+00> : vector<4xf32>
      %21 = vector.multi_reduction <add>, %6, %cst_15 [1] : vector<4x64xf32> to vector<4xf32>
      %22 = vector.shape_cast %21 : vector<4xf32> to vector<4x1xf32>
      %23 = arith.addf %20, %22 : vector<4x1xf32>
      %c0_16 = arith.constant 0 : index
      %c0_17 = arith.constant 0 : index
      %24 = vector.load %arg9[%c0_16, %c0_17] : memref<4x1xf32, #tpu.memory_space<vmem>>, vector<4x1xf32>
      tpu.vector_store %arg9[%c0_16, %c0_17], %23 {strides = array<i32>} : memref<4x1xf32, #tpu.memory_space<vmem>>, vector<4x1xf32>,
      %c0_18 = arith.constant 0 : index
      %c0_19 = arith.constant 0 : index
      %25 = vector.load %arg10[%c0_18, %c0_19] : memref<4x1xf32, #tpu.memory_space<vmem>>, vector<4x1xf32>
      %26 = arith.mulf %6, %6 : vector<4x64xf32>
      %cst_20 = arith.constant dense<0.000000e+00> : vector<4xf32>
      %27 = vector.multi_reduction <add>, %26, %cst_20 [1] : vector<4x64xf32> to vector<4xf32>
      %28 = vector.shape_cast %27 : vector<4xf32> to vector<4x1xf32>
      %29 = arith.addf %25, %28 : vector<4x1xf32>
      %c0_21 = arith.constant 0 : index
      %c0_22 = arith.constant 0 : index
      %30 = vector.load %arg10[%c0_21, %c0_22] : memref<4x1xf32, #tpu.memory_space<vmem>>, vector<4x1xf32>
      tpu.vector_store %arg10[%c0_21, %c0_22], %29 {strides = array<i32>} : memref<4x1xf32, #tpu.memory_space<vmem>>, vector<4x1xf32>,
    } else {
    }
    %c1_i32 = arith.constant 1 : i32
    %17 = arith.cmpi eq, %arg1, %c1_i32 : i32
    %18 = arith.extui %17 : i1 to i32
    %c0_i32_12 = arith.constant 0 : i32
    %19 = arith.cmpi ne, %18, %c0_i32_12 : i32
    scf.if %19 {
      %c0_13 = arith.constant 0 : index
      %c0_14 = arith.constant 0 : index
      %20 = vector.load %arg9[%c0_13, %c0_14] : memref<4x1xf32, #tpu.memory_space<vmem>>, vector<4x1xf32>
      %cst_15 = arith.constant 7.812500e-03 : f32
      %21 = vector.broadcast %cst_15 : f32 to vector<4x1xf32>
      %22 = arith.mulf %20, %21 : vector<4x1xf32>
      %c0_16 = arith.constant 0 : index
      %c0_17 = arith.constant 0 : index
      %23 = vector.load %arg10[%c0_16, %c0_17] : memref<4x1xf32, #tpu.memory_space<vmem>>, vector<4x1xf32>
      %cst_18 = arith.constant 7.812500e-03 : f32
      %24 = vector.broadcast %cst_18 : f32 to vector<4x1xf32>
      %25 = arith.mulf %23, %24 : vector<4x1xf32>
      %26 = arith.mulf %22, %22 : vector<4x1xf32>
      %27 = arith.subf %25, %26 : vector<4x1xf32>
      %cst_19 = arith.constant 0.000000e+00 : f32
      %28 = vector.broadcast %cst_19 : f32 to vector<4x1xf32>
      %29 = arith.maximumf %27, %28 : vector<4x1xf32>
      %c0_20 = arith.constant 0 : index
      %c0_21 = arith.constant 0 : index
      %c0_22 = arith.constant 0 : index
      %30 = vector.load %arg6[%c0_20, %c0_21, %c0_22] : memref<1x4x1xf32, #tpu.memory_space<vmem>>, vector<1x4x1xf32>
      %31 = vector.shape_cast %30 : vector<1x4x1xf32> to vector<4x1xf32>
      %cst_23 = arith.constant 9.99999974E-6 : f32
      %32 = vector.broadcast %cst_23 : f32 to vector<4x1xf32>
      %33 = arith.addf %29, %32 : vector<4x1xf32>
      %34 = math.rsqrt %33 : vector<4x1xf32>
      %35 = arith.mulf %31, %34 : vector<4x1xf32>
      %c0_24 = arith.constant 0 : index
      %c0_25 = arith.constant 0 : index
      %c0_26 = arith.constant 0 : index
      %36 = vector.load %arg7[%c0_24, %c0_25, %c0_26] : memref<1x4x1xf32, #tpu.memory_space<vmem>>, vector<1x4x1xf32>
      %37 = vector.shape_cast %36 : vector<1x4x1xf32> to vector<4x1xf32>
      %38 = arith.mulf %22, %35 : vector<4x1xf32>
      %39 = arith.subf %37, %38 : vector<4x1xf32>
      %40 = vector.broadcast %35 : vector<4x1xf32> to vector<4x64xf32>
      %41 = arith.mulf %6, %40 : vector<4x64xf32>
      %42 = vector.broadcast %39 : vector<4x1xf32> to vector<4x64xf32>
      %43 = arith.addf %41, %42 : vector<4x64xf32>
      %c0_27 = arith.constant 0 : index
      %c0_28 = arith.constant 0 : index
      %c0_29 = arith.constant 0 : index
      %c0_30 = arith.constant 0 : index
      %44 = vector.load %arg8[%c0_27, %c0_28, %c0_29, %c0_30] : memref<1x1x4x64xf32, #tpu.memory_space<vmem>>, vector<1x1x4x64xf32>
      %45 = vector.shape_cast %44 : vector<1x1x4x64xf32> to vector<4x64xf32>
      %46 = vector.shape_cast %43 : vector<4x64xf32> to vector<1x1x4x64xf32>
      tpu.vector_store %arg8[%c0_27, %c0_28, %c0_29, %c0_30], %46 {strides = array<i32>} : memref<1x1x4x64xf32, #tpu.memory_space<vmem>>, vector<1x1x4x64xf32>,
    } else {
    }
    return
  }
  func.func @transform_0(%arg0: i32, %arg1: i32, %arg2: i32, %arg3: i32) -> (i32, i32, i32, i32) {
    %c0_i32 = arith.constant 0 : i32
    %c0_i32_0 = arith.constant 0 : i32
    return %arg0, %arg2, %c0_i32, %arg3 : i32, i32, i32, i32
  }
  func.func @transform_1(%arg0: i32, %arg1: i32, %arg2: i32, %arg3: i32) -> (i32, i32, i32) {
    %c0_i32 = arith.constant 0 : i32
    %c0_i32_0 = arith.constant 0 : i32
    %c0_i32_1 = arith.constant 0 : i32
    return %arg0, %c0_i32, %c0_i32_0 : i32, i32, i32
  }
  func.func @transform_2(%arg0: i32, %arg1: i32, %arg2: i32, %arg3: i32) -> (i32, i32, i32) {
    %c0_i32 = arith.constant 0 : i32
    %c0_i32_0 = arith.constant 0 : i32
    %c0_i32_1 = arith.constant 0 : i32
    return %arg0, %c0_i32, %c0_i32_0 : i32, i32, i32
  }
  func.func @transform_3(%arg0: i32, %arg1: i32, %arg2: i32, %arg3: i32) -> (i32, i32, i32) {
    %c0_i32 = arith.constant 0 : i32
    %c0_i32_0 = arith.constant 0 : i32
    %c0_i32_1 = arith.constant 0 : i32
    return %arg0, %c0_i32, %c0_i32_0 : i32, i32, i32
  }
  func.func @transform_4(%arg0: i32, %arg1: i32, %arg2: i32, %arg3: i32) -> (i32, i32, i32, i32) {
    %0 = arith.muli %arg2, %arg1 : i32
    %1 = arith.muli %arg3, %arg1 : i32
    %c0_i32 = arith.constant 0 : i32
    %c0_i32_0 = arith.constant 0 : i32
    return %0, %arg0, %c0_i32, %1 : i32, i32, i32, i32
  }
}

</mosaic_0001>

<bundles_post_ra>
// kernel: factorized_reduce.1
= control target key start
LH: loop header
LB: loop body
LE: loop exit
PB: predicated region body
PF: predicated region fallthrough
CT: control target
= control target key end

     0   :  { %s739_s15 = smov 0   ;;  %s741_s16 = smov 0   ;;  %s847_s0 = inlined_call_operand.vmem [shape: f32[2,2,4,64], index: 0, kind: input, shape index: {}]   ;;  %s848_s1 = inlined_call_operand.vmem [shape: f32[2,4,4], index: 1, kind: input, shape index: {}]   ;;  %s849_s2 = inlined_call_operand.vmem [shape: f32[2,4,1], index: 2, kind: input, shape index: {}]   ;;  %s850_s3 = inlined_call_operand.vmem [shape: f32[2,4,1], index: 3, kind: input, shape index: {}]   ;;  %s851_s4 = inlined_call_operand.vmem [shape: f32[2,2,4,64], index: 4, kind: output, shape index: {}]  }
   0x1   :  { %s743_s17 = smov 0   ;;  %s745_s18 = smov 0  }
   0x2   :  { %s747_s19 = smov 0   ;;  %s749_s20 = smov 0  }
   0x3   :  { %s751_s21 = smov 0  }
   0x4 LB: > { %s32_s22 = sadd.s32 1, %s698_s18  ;;  %s36_s23 = sadd.s32 1, %s702_s19  ;;  %s710_s21 = sphi %s751_s21, %s14_s21   ;;  %s706_s20 = sphi %s749_s20, %s857_s20   ;;  %s702_s19 = sphi %s747_s19, %s856_s19   ;;  %s698_s18 = sphi %s745_s18, %s855_s18   ;;  %s694_s17 = sphi %s743_s17, %s854_s17   ;;  %s690_s16 = sphi %s741_s16, %s853_s16   ;;  %s686_s15 = sphi %s739_s15, %s852_s15  }
   0x5   : > { %p34_p0 = scmp.ge.s32.totalorder %s32_s22, 2  ;;  %p580_p1 = scmp.ge.s32.totalorder %s710_s21, 1 }
   0x6   : > { %p233_p2 = scmp.lt.s32.totalorder %s710_s21, 9  ;;  %s40_s24 = sadd.s32 1, %s706_s20 }
   0x7   : > { %s859_s22 = smov (%p34_p0, %s32_s22), 0  ;;  %s861_s23 = smov (!%p34_p0, %s36_s23), %s702_s19 }
   0x8   : > { %p234_p3 = pnand %p580_p1, %p233_p2  ;;  %p38_p4 = scmp.ge.s32.totalorder %s861_s23, 2 }
   0x9   : > { %p285_p6 = scmp.lt.s32.totalorder (!%p234_p3), %s694_s17, 1  ;;  %p287_p7 = scmp.lt.s32.totalorder (!%p234_p3), %s686_s15, 1 }
   0xa   : > { %s863_s23 = smov (%p38_p4, %s861_s23), 0  ;;  %s865_s24 = smov (!%p38_p4, %s40_s24), %s706_s20 }
   0xb   : > { %p42_p5 = scmp.ge.s32.totalorder %s865_s24, 2  ;;  %237 = sbr.rel (%p234_p3) target bundleno = 455 (0x1c7), region = 36 }
   0xc   : > { %s308_s25 = smul.u32 (!%p234_p3), %s686_s15, %s690_s16  ;;  %p354_p9 = scmp.eq.s32.totalorder (!%p234_p3), %s690_s16, 0 }
   0xd   : > { %s867_s24 = smov (%p42_p5, %s865_s24), 0  ;;  %p355_p10 = scmp.eq.s32.totalorder (!%p234_p3), %s686_s15, 0 }
   0xe   : > { %p310_p8 = scmp.lt.s32.totalorder (!%p234_p3), %s308_s25, 1 }
   0xf   : > { %p356_p11 = pnand (!%p234_p3), %p355_p10, %p354_p9 }
  0x10   : > { %s869_s17 = smov (!%p285_p6, %s694_s17), 1  ;;  %s871_s25 = smov (!%p310_p8, %s308_s25), 1  ;;  %vm330_vm0 = vcmask 1043456   ;;  %vm326_vm1 = vcmask 31744  }
  0x11   : > { %s288_s26 = scalar_select %p287_p7, %s686_s15, 1 }
  0x12   : > { %s581_s27 = sshll.u32 %s869_s17, 1  ;;  %s789_s29 = sshll.u32 %s869_s17, 2 }
  0x13   : > { %s293_s28 = sadd.s32 %s581_s27, %s288_s26  ;;  %s299_s7 = scalar_lea.vmem %s848_s1, %s789_s29 }
  0x14   : > { %s582_s30 = sshll.u32 %s293_s28, 2  ;;  %s303_s13 = scalar_lea.vmem %s849_s2, %s789_s29  ;;  %v325_v2 = vld [vmem:[%s299_s7] sm:$0xf] }
  0x15   : > { %s295_s10 = scalar_lea.vmem %s847_s0, %s582_s30  ;;  %s307_s27 = scalar_lea.vmem %s850_s3, %s789_s29 }
  0x16   : > { %v323_v0 = vld [vmem:[%s295_s10] sm:$0xf]  ;;  %s586_s28 = sshll.u32 %s871_s25, 1 }
  0x17   : > { %v324_v1 = vmax.f32 %v323_v0, 0.0  ;;  %s318_s5 = sadd.s32 %s586_s28, %s869_s17 }
  0x18   : > { %s587_s30 = sshll.u32 %s318_s5, 2 }
  0x19   : > { %588 = vmatpush.msk.msra.mxu0 %vm330_vm0, %v324_v1  ;;  %s811_s9 = scalar_lea.vmem %s851_s4, %s587_s30 }
  0x1a   : > { %589 = vmatmul.msk.f32.vlgmr.msra.gmra.mxu0 %vm326_vm1, %v325_v2 }
  0x93   : > { %362 = sbr.rel (%p356_p11) target bundleno = 155 (0x9b), region = 40 }
  0x97   : > { %v351_v3 = vpop.f32.mrf.mxu0 }
  0x98   : > { %vm363_vm2 = vcmask 3072   ;;  %v712_v4 = vmov 0.0  }
  0x99   : > { %364 = vst.msk [vmem:[#allocation2] sm:$0xf] %vm363_vm2, %v712_v4 }
  0x9a   : > { %365 = vst.msk [vmem:[#allocation3] sm:$0xf] %vm363_vm2, %v712_v4 }
  0x9b PF: > { %p591_p12 = scmp.ne.s32.totalorder %s690_s16, 0 }
  0x9d   : > { %368 = sbr.rel (%p591_p12) target bundleno = 291 (0x123), region = 44 }
  0xa2   : > { %vm370_vm3 = vcmask 519168   ;;  %v378_v6 = vmul.f32 %v351_v3, %v351_v3  ;;  %v369_v8 = vld [vmem:[#allocation2] sm:$0xf]  ;;  %vm375_vm4 = vcmask 3072   ;;  %v377_v11 = vld [vmem:[#allocation3] sm:$0xf] }
  0xa3   : > { %v371_v5 = vsel %vm370_vm3, %v351_v3, 0.0 }
  0xa4   : > { %372 = vadd.xlane.f32.xlu0 %v371_v5  ;;  %v379_v7 = vsel %vm370_vm3, %v378_v6, 0.0 }
  0xac   : > { %380 = vadd.xlane.f32.xlu0 %v379_v7 }
 0x117   : > { %v373_v9 = vpop.xlane.xlu0 %372 }
 0x118   : > { %v374_v10 = vadd.f32 %v373_v9, %v369_v8 }
 0x11a   : > { %376 = vst.msk [vmem:[#allocation2] sm:$0xf] %vm375_vm4, %v374_v10 }
 0x11f   : > { %v381_v12 = vpop.xlane.xlu0 %380 }
 0x120   : > { %v382_v13 = vadd.f32 %v381_v12, %v377_v11 }
 0x122   : > { %383 = vst.msk [vmem:[#allocation3] sm:$0xf] %vm375_vm4, %v382_v13 }
 0x123 PF: > { %p592_p13 = scmp.ne.s32.totalorder %s690_s16, 1 }
 0x125   : > { %387 = sbr.rel (%p592_p13) target bundleno = 455 (0x1c7), region = 48 }
 0x12a   : > { %v388_v14 = vld [vmem:[#allocation2] sm:$0xf]  ;;  %v390_v15 = vld [vmem:[#allocation3] sm:$0xf]  ;;  %v713_v16 = vmov 0   ;;  %vm423_vm8 = vcmask 519168  }
 0x12b   : > { %653 = vset.pattern.permute.xlu0 %v713_v16  ;;  %v389_v17 = vmul.f32 0.0078125, %v388_v14  ;;  %v391_v18 = vmul.f32 0.0078125, %v390_v15  ;;  %v395_v28 = vld [vmem:[%s303_s13] sm:$0xf] }
 0x12c   : > { %v408_v33 = vld [vmem:[%s307_s27] sm:$0xf] }
 0x12d   : > { %v392_v19 = vmul.f32 %v389_v17, %v389_v17 }
 0x12f   : > { %v393_v20 = vsub.f32 %v391_v18, %v392_v19 }
 0x131   : > { %v394_v21 = vmax.f32 %v393_v20, 0.0 }
 0x133   : > { %v396_v22 = vadd.f32 1e-05, %v394_v21 }
 0x135   : > { %654 = vrsqrt.f32 %v396_v22  ;;  %vm403_vm5 = vweird.f32 %v396_v22 }
 0x13b   : > { %v655_v23 = vpop.eup %654 }
 0x13c   : > { %v398_v24 = vmul.f32 %v655_v23, %v396_v22  ;;  %vm404_vm6 = vweird.f32 %v655_v23 }
 0x13d   : > { %vm405_vm7 = vmor %vm403_vm5, %vm404_vm6 }
 0x13e   : > { %v399_v25 = vmul.f32 %v655_v23, %v398_v24 }
 0x140   : > { %v400_v26 = vmul.f32 0.5, %v399_v25 }
 0x142   : > { %v401_v27 = vsub.f32 1.5, %v400_v26 }
 0x144   : > { %v402_v29 = vmul.f32 %v655_v23, %v401_v27 }
 0x146   : > { %v406_v30 = vsel %vm405_vm7, %v655_v23, %v402_v29 }
 0x147   : > { %v407_v31 = vmul.f32 %v406_v30, %v395_v28 }
 0x149   : > { %413 = vperm.xlu0 %653, %v407_v31   ;;  %v409_v32 = vmul.f32 %v407_v31, %v389_v17 }
 0x14b   : > { %v410_v34 = vsub.f32 %v408_v33, %v409_v32 }
 0x151   : > { %419 = vperm.xlu0 %653, %v410_v34  }
 0x1bb   : > { %v414_v35 = vpop.permute.xlu0 %413 }
 0x1bc   : > { %v416_v36 = vmul.f32 %v414_v35, %v351_v3 }
 0x1c3   : > { %v420_v37 = vpop.permute.xlu0 %419 }
 0x1c4   : > { %v422_v38 = vadd.f32 %v420_v37, %v416_v36 }
 0x1c6   : > { %424 = vst.msk [vmem:[%s811_s9] sm:$0xf] %vm423_vm8, %v422_v38 }
 0x1c7 PF: > { %s14_s21 = sadd.s32 1, %s710_s21   ;;  %s852_s15 = smov %s698_s18 }
 0x1c8   : > { %p11_p0 = scmp.ge.s32.totalorder %s14_s21, 10   ;;  %s853_s16 = smov %s702_s19 }
 0x1c9   : > { %s854_s17 = smov %s706_s20  ;;  %s855_s18 = smov %s859_s22 }
 0x1ca   : > { %s856_s19 = smov %s863_s23  ;;  %s857_s20 = smov %s867_s24 }
 0x1cb   :  { %13 = sbr.rel (!%p11_p0) target bundleno = 4 (0x4), region = 87 }

</bundles_post_ra>
